<compile_context>
chip_gen: v7x
topology: tpu7x:2x2x1
jax: 0.10.0
libtpu: 0.0.40
codegen_flags: <defaults>
</compile_context>

<pallas_src>
import jax
import jax.numpy as jnp
from jax.experimental import pallas as pl
from jax.experimental.pallas import tpu as pltpu


def _round_up(x, m):
    return -(-x // m) * m


def _make_kernel(precision):
    def kernel(a_ref, l_ref, wga_ref, wgl_ref, bg_ref, wo_ref, o_ref):
        # a_ref/l_ref/o_ref: (nb, Cp, TS) tiles; weights (Cp, Cp); bias (Cp, 1).
        wga = wga_ref[...]
        wgl = wgl_ref[...]
        wo = wo_ref[...]
        bg = bg_ref[...].astype(jnp.float32)      # (Cp, 1) broadcasts over lanes

        for i in range(a_ref.shape[0]):           # static unroll over batch block
            a = a_ref[i]                          # (Cp, TS), native dtype -> MXU
            l = l_ref[i]
            # Gate 1x1 conv on concatenated channels == two (Cp,Cp)@(Cp,TS)
            # MXU matmuls + bias, accumulated in f32.
            logits = (
                jnp.dot(wga, a, preferred_element_type=jnp.float32,
                        precision=precision)
                + jnp.dot(wgl, l, preferred_element_type=jnp.float32,
                          precision=precision)
                + bg)
            gate = jax.nn.sigmoid(logits)         # f32 (EUP)
            # gate*a + (1-gate)*l == l + gate*(a-l); dtype promotion keeps the
            # blend math in f32 without a blanket f32 upcast of the a/l tiles.
            fuse = gate * (a - l) + l
            out = jnp.dot(wo, fuse, preferred_element_type=jnp.float32,
                          precision=precision)
            o_ref[i] = out.astype(o_ref.dtype)

    return kernel


def _pack_factor(C, S, itemsize):
    """Spatial->channel folding factor so tiny C fills the vreg sublanes."""
    sub = max(8, 32 // itemsize)                  # 8 rows for f32, 16 for bf16
    if C >= sub or sub % C != 0:
        return 1
    k = sub // C
    while k > 1 and S % k != 0:
        k //= 2
    return k


def _vmem_budget():
    """Generation-aware cap on requested VMEM: <= ~40 MiB on v7x (64 MiB
    physical), <= 80 MiB on v5e/v6e (128 MiB physical)."""
    cap = 64 * 1024 * 1024
    try:
        cap = int(getattr(pltpu.get_tpu_info(), "vmem_capacity_bytes", cap))
    except Exception:
        pass
    return min(cap * 5 // 8, 80 * 1024 * 1024)


def _choose_tiles(B, Cp, Sp, itemsize, w_itemsize):
    """Pick (batch block nb, spatial tile ts, vmem_limit_bytes)."""
    # Honest VMEM accounting: channel rows pad to 8 (f32) / 16 (bf16) sublanes
    # and the kernel materializes ~5 full-tile f32 intermediates per image.
    cp_in = _round_up(Cp, max(8, 32 // itemsize))
    cp_f32 = _round_up(Cp, 8)
    per_col = 6 * cp_in * itemsize + 5 * cp_f32 * 4   # bytes / lane col, nb=1
    w_bytes = 2 * (3 * Cp * Cp + Cp) * w_itemsize     # double-buffered weights
    headroom = 2 << 20
    budget = _vmem_budget()
    avail = max(budget - w_bytes - headroom, 1 << 20)

    # ~2 MiB per input block: big enough to amortize the ~0.35us/step cost and
    # sit near the HBM roofline, small enough to stay inside the budget.
    target = 2 << 20
    ts = min(max(target // (cp_in * itemsize), 128), max(avail // per_col, 128))
    if B == 1 and Sp > 128:
        # Keep >= 2 spatial grid steps so both v7x TensorCores get work.
        ts = min(ts, _round_up(-(-Sp // 2), 128))
    if ts >= Sp:
        ts = Sp                                   # one full-extent block (any Sp)
    else:
        ts = max(128, ts // 128 * 128)            # tiled: multiple of 128
    n_s = pl.cdiv(Sp, ts)

    # Small images: block several batch elements per step so DMAs stay large.
    nb = 1
    if n_s == 1:
        blk = max(cp_in * ts * itemsize, 1)
        nb = max(1, min(B, target // blk, avail // (per_col * ts)))
        if B >= 2:
            nb = min(nb, max(B // 2, 1))          # keep >= 2 grid steps (megacore)

    vmem = nb * per_col * ts + w_bytes + headroom
    vmem = int(min(max(vmem, 4 << 20), budget))
    return int(nb), int(ts), vmem


def learnable_gating_fusion(A, L, w_gate, b_gate, w_out, *, precision=None):
    """A, L: [B, C, H, W].  w_gate: [C, 2C], b_gate: [C], w_out: [C, C]
    (PyTorch Conv2d weights with the trailing 1x1 kernel dims squeezed)."""
    B, C, H, W = A.shape
    S = H * W
    itemsize = jnp.dtype(A.dtype).itemsize

    # Sublane packing for tiny C: (C, S) -> (C*k, S/k) free row-major reshape.
    k = _pack_factor(C, S, itemsize)
    Cp, Sp = C * k, S // k

    # NCHW -> (B, Cp, Sp): contiguous trailing-dim reshape, no transpose/copy.
    a3 = A.reshape(B, Cp, Sp)
    l3 = L.reshape(B, Cp, Sp)

    # Conv2d(2C->C, 1) acts as W @ x on channels; split into the halves that
    # multiply A's / L's channels and lift everything to the packed basis.
    eye_k = jnp.eye(k, dtype=w_gate.dtype)
    wga = jnp.kron(w_gate[:, :C], eye_k)                      # (Cp, Cp)
    wgl = jnp.kron(w_gate[:, C:], eye_k)                      # (Cp, Cp)
    wo = jnp.kron(w_out, jnp.eye(k, dtype=w_out.dtype))       # (Cp, Cp)
    bg = jnp.repeat(b_gate, k).reshape(Cp, 1)                 # broadcasts on lanes

    nb, ts, vmem_bytes = _choose_tiles(
        B, Cp, Sp, itemsize, jnp.dtype(w_gate.dtype).itemsize)
    grid = (pl.cdiv(B, nb), pl.cdiv(Sp, ts))

    # No jnp.pad / output slice: partial last blocks (batch or spatial) are
    # handled by Pallas (padded reads, masked stores) -- safe here because
    # each lane/image is computed independently.
    # TODO(synk): single-buffer the grid-invariant weight/bias blocks
    # (pipeline_mode=pl.Buffered(1)) once it is reliable on auto-pipelined
    # pallas_call inputs; only matters for large C on v7x's 64 MiB VMEM.
    out3 = pl.pallas_call(
        _make_kernel(precision),
        out_shape=jax.ShapeDtypeStruct((B, Cp, Sp), A.dtype),
        grid_spec=pltpu.PrefetchScalarGridSpec(
            num_scalar_prefetch=0,
            grid=grid,
            in_specs=[
                pl.BlockSpec((nb, Cp, ts), lambda b, s: (b, 0, s)),  # A tiles
                pl.BlockSpec((nb, Cp, ts), lambda b, s: (b, 0, s)),  # L tiles
                pl.BlockSpec((Cp, Cp), lambda b, s: (0, 0)),   # gate W (A half)
                pl.BlockSpec((Cp, Cp), lambda b, s: (0, 0)),   # gate W (L half)
                pl.BlockSpec((Cp, 1), lambda b, s: (0, 0)),    # gate bias
                pl.BlockSpec((Cp, Cp), lambda b, s: (0, 0)),   # output W
            ],
            out_specs=pl.BlockSpec((nb, Cp, ts), lambda b, s: (b, 0, s)),
        ),
        compiler_params=pltpu.CompilerParams(
            # Both grid axes are independent -> megacore-shardable on v7x.
            dimension_semantics=("parallel", "parallel"),
            vmem_limit_bytes=vmem_bytes),
    )(a3, l3, wga, wgl, bg, wo)

    # Undo the packing (free reshapes, same buffer layout).
    return out3.reshape(B, C, H, W)


def _reference(A, L, w_gate, b_gate, w_out):
    hi = jax.lax.Precision.HIGHEST
    A = A.astype(jnp.float32)
    L = L.astype(jnp.float32)
    w_gate = w_gate.astype(jnp.float32)
    b_gate = b_gate.astype(jnp.float32)
    w_out = w_out.astype(jnp.float32)
    cat = jnp.concatenate([A, L], axis=1)                      # (B, 2C, H, W)
    logits = jnp.einsum('bihw,oi->bohw', cat, w_gate,
                        precision=hi) + b_gate[None, :, None, None]
    gate = jax.nn.sigmoid(logits)
    fuse = gate * A + (1.0 - gate) * L
    return jnp.einsum('bihw,oi->bohw', fuse, w_out, precision=hi)


if __name__ == "__main__":
    hi = jax.lax.Precision.HIGHEST
    key = jax.random.PRNGKey(0)
    cases = [
        # (B, C, H, W, dtype, atol, rtol)
        (2, 4, 16, 16, jnp.float32, 1e-4, 1e-4),   # baseline (spec shape)
        (3, 4, 17, 13, jnp.float32, 1e-4, 1e-4),   # ragged spatial, no packing
        (2, 8, 24, 32, jnp.bfloat16, 2e-2, 2e-2),  # bf16 end-to-end, packed x2
        (8, 4, 8, 8, jnp.float32, 1e-4, 1e-4),     # tiny images -> batched blocks
        (1, 4, 20, 20, jnp.float32, 1e-4, 1e-4),   # multi-tile spatial, partial block
    ]
    for (B, C, H, W, dtype, atol, rtol) in cases:
        key, kA, kL, kWg, kBg, kWo = jax.random.split(key, 6)
        A = jax.random.normal(kA, (B, C, H, W), dtype=jnp.float32).astype(dtype)
        L = jax.random.normal(kL, (B, C, H, W), dtype=jnp.float32).astype(dtype)
        # Deterministic params (nn.Conv2d 1x1 weights with kernel dims squeezed)
        w_gate = (jax.random.normal(kWg, (C, 2 * C), jnp.float32) * 0.1).astype(dtype)
        b_gate = (jax.random.normal(kBg, (C,), jnp.float32) * 0.1).astype(dtype)
        w_out = (jax.random.normal(kWo, (C, C), jnp.float32) * 0.1).astype(dtype)

        # Self-test uses HIGHEST so the f32 reference comparison stays tight;
        # production callers should keep the default (None) precision.
        out = learnable_gating_fusion(A, L, w_gate, b_gate, w_out, precision=hi)
        out = jax.block_until_ready(out)

        ref = _reference(A, L, w_gate, b_gate, w_out)
        assert out.shape == (B, C, H, W)
        assert out.dtype == A.dtype
        assert jnp.allclose(out.astype(jnp.float32), ref, atol=atol, rtol=rtol), \
            f"mismatch vs reference for case {(B, C, H, W, str(dtype))}"

    print("KERNEL_OK")
</pallas_src>

<mosaic_0001>
module attributes {stable_mosaic.version = 11 : i64} {
  func.func @kernel(%arg0: i32, %arg1: i32, %arg2: memref<1x8x128xf32, #tpu.memory_space<vmem>>, %arg3: memref<1x8x128xf32, #tpu.memory_space<vmem>>, %arg4: memref<8x8xf32, #tpu.memory_space<vmem>>, %arg5: memref<8x8xf32, #tpu.memory_space<vmem>>, %arg6: memref<8x1xf32, #tpu.memory_space<vmem>>, %arg7: memref<8x8xf32, #tpu.memory_space<vmem>>, %arg8: memref<1x8x128xf32, #tpu.memory_space<vmem>>) attributes {dimension_semantics = [#tpu.dimension_semantics<parallel>, #tpu.dimension_semantics<parallel>], iteration_bounds = array<i64: 2, 1>, scalar_prefetch = 0 : i64, scratch_operands = 0 : i64, tpu.core_type = #tpu.core_type<tc>, window_params = [{transform_indices = @transform_0, window_bounds = array<i64: 1, 8, 128>}, {transform_indices = @transform_1, window_bounds = array<i64: 1, 8, 128>}, {pipeline_mode = #tpu.pipeline_mode<synchronous>, transform_indices = @transform_2, window_bounds = array<i64: 8, 8>}, {pipeline_mode = #tpu.pipeline_mode<synchronous>, transform_indices = @transform_3, window_bounds = array<i64: 8, 8>}, {pipeline_mode = #tpu.pipeline_mode<synchronous>, transform_indices = @transform_4, window_bounds = array<i64: 8, 1>}, {pipeline_mode = #tpu.pipeline_mode<synchronous>, transform_indices = @transform_5, window_bounds = array<i64: 8, 8>}, {transform_indices = @transform_6, window_bounds = array<i64: 1, 8, 128>}]} {
    %c0 = arith.constant 0 : index
    %c0_0 = arith.constant 0 : index
    %0 = vector.load %arg4[%c0, %c0_0] : memref<8x8xf32, #tpu.memory_space<vmem>>, vector<8x8xf32>
    %c0_1 = arith.constant 0 : index
    %c0_2 = arith.constant 0 : index
    %1 = vector.load %arg5[%c0_1, %c0_2] : memref<8x8xf32, #tpu.memory_space<vmem>>, vector<8x8xf32>
    %c0_3 = arith.constant 0 : index
    %c0_4 = arith.constant 0 : index
    %2 = vector.load %arg7[%c0_3, %c0_4] : memref<8x8xf32, #tpu.memory_space<vmem>>, vector<8x8xf32>
    %c0_5 = arith.constant 0 : index
    %c0_6 = arith.constant 0 : index
    %3 = vector.load %arg6[%c0_5, %c0_6] : memref<8x1xf32, #tpu.memory_space<vmem>>, vector<8x1xf32>
    %c0_7 = arith.constant 0 : index
    %c0_8 = arith.constant 0 : index
    %c0_9 = arith.constant 0 : index
    %4 = vector.load %arg2[%c0_7, %c0_8, %c0_9] : memref<1x8x128xf32, #tpu.memory_space<vmem>>, vector<1x8x128xf32>
    %5 = vector.shape_cast %4 : vector<1x8x128xf32> to vector<8x128xf32>
    %c0_10 = arith.constant 0 : index
    %c0_11 = arith.constant 0 : index
    %c0_12 = arith.constant 0 : index
    %6 = vector.load %arg3[%c0_10, %c0_11, %c0_12] : memref<1x8x128xf32, #tpu.memory_space<vmem>>, vector<1x8x128xf32>
    %7 = vector.shape_cast %6 : vector<1x8x128xf32> to vector<8x128xf32>
    %cst = arith.constant dense<0.000000e+00> : vector<8x128xf32>
    %8 = tpu.matmul %0, %5, %cst {dimension_numbers = #tpu.dot_dimension_numbers<[1], [0], [0], [1], [0, 0, 1, 1], [], []>, precision = #tpu.contract_precision<fp32>} : vector<8x8xf32>, vector<8x128xf32>, vector<8x128xf32> -> vector<8x128xf32>
    %cst_13 = arith.constant dense<0.000000e+00> : vector<8x128xf32>
    %9 = tpu.matmul %1, %7, %cst_13 {dimension_numbers = #tpu.dot_dimension_numbers<[1], [0], [0], [1], [0, 0, 1, 1], [], []>, precision = #tpu.contract_precision<fp32>} : vector<8x8xf32>, vector<8x128xf32>, vector<8x128xf32> -> vector<8x128xf32>
    %10 = arith.addf %8, %9 : vector<8x128xf32>
    %11 = vector.broadcast %3 : vector<8x1xf32> to vector<8x128xf32>
    %12 = arith.addf %10, %11 : vector<8x128xf32>
    %13 = arith.negf %12 : vector<8x128xf32>
    %14 = math.exp %13 : vector<8x128xf32>
    %cst_14 = arith.constant 1.000000e+00 : f32
    %15 = vector.broadcast %cst_14 : f32 to vector<8x128xf32>
    %16 = arith.addf %15, %14 : vector<8x128xf32>
    %17 = arith.divf %15, %16 : vector<8x128xf32>
    %18 = arith.subf %5, %7 : vector<8x128xf32>
    %19 = arith.mulf %17, %18 : vector<8x128xf32>
    %20 = arith.addf %19, %7 : vector<8x128xf32>
    %cst_15 = arith.constant dense<0.000000e+00> : vector<8x128xf32>
    %21 = tpu.matmul %2, %20, %cst_15 {dimension_numbers = #tpu.dot_dimension_numbers<[1], [0], [0], [1], [0, 0, 1, 1], [], []>, precision = #tpu.contract_precision<fp32>} : vector<8x8xf32>, vector<8x128xf32>, vector<8x128xf32> -> vector<8x128xf32>
    %c0_16 = arith.constant 0 : index
    %c0_17 = arith.constant 0 : index
    %c0_18 = arith.constant 0 : index
    %22 = vector.load %arg8[%c0_16, %c0_17, %c0_18] : memref<1x8x128xf32, #tpu.memory_space<vmem>>, vector<1x8x128xf32>
    %23 = vector.shape_cast %22 : vector<1x8x128xf32> to vector<8x128xf32>
    %24 = vector.shape_cast %21 : vector<8x128xf32> to vector<1x8x128xf32>
    tpu.vector_store %arg8[%c0_16, %c0_17, %c0_18], %24 {strides = array<i32>} : memref<1x8x128xf32, #tpu.memory_space<vmem>>, vector<1x8x128xf32>,
    return
  }
  func.func @transform_0(%arg0: i32, %arg1: i32) -> (i32, i32, i32) {
    %c0_i32 = arith.constant 0 : i32
    %c0_i32_0 = arith.constant 0 : i32
    return %arg0, %c0_i32, %arg1 : i32, i32, i32
  }
  func.func @transform_1(%arg0: i32, %arg1: i32) -> (i32, i32, i32) {
    %c0_i32 = arith.constant 0 : i32
    %c0_i32_0 = arith.constant 0 : i32
    return %arg0, %c0_i32, %arg1 : i32, i32, i32
  }
  func.func @transform_2(%arg0: i32, %arg1: i32) -> (i32, i32) {
    %c0_i32 = arith.constant 0 : i32
    %c0_i32_0 = arith.constant 0 : i32
    %c0_i32_1 = arith.constant 0 : i32
    return %c0_i32, %c0_i32_0 : i32, i32
  }
  func.func @transform_3(%arg0: i32, %arg1: i32) -> (i32, i32) {
    %c0_i32 = arith.constant 0 : i32
    %c0_i32_0 = arith.constant 0 : i32
    %c0_i32_1 = arith.constant 0 : i32
    return %c0_i32, %c0_i32_0 : i32, i32
  }
  func.func @transform_4(%arg0: i32, %arg1: i32) -> (i32, i32) {
    %c0_i32 = arith.constant 0 : i32
    %c0_i32_0 = arith.constant 0 : i32
    %c0_i32_1 = arith.constant 0 : i32
    return %c0_i32, %c0_i32_0 : i32, i32
  }
  func.func @transform_5(%arg0: i32, %arg1: i32) -> (i32, i32) {
    %c0_i32 = arith.constant 0 : i32
    %c0_i32_0 = arith.constant 0 : i32
    %c0_i32_1 = arith.constant 0 : i32
    return %c0_i32, %c0_i32_0 : i32, i32
  }
  func.func @transform_6(%arg0: i32, %arg1: i32) -> (i32, i32, i32) {
    %c0_i32 = arith.constant 0 : i32
    %c0_i32_0 = arith.constant 0 : i32
    return %arg0, %c0_i32, %arg1 : i32, i32, i32
  }
}

</mosaic_0001>

<bundles_post_ra>
// kernel: tpu_custom_call.1
= control target key start
LH: loop header
LB: loop body
LE: loop exit
PB: predicated region body
PF: predicated region fallthrough
CT: control target
= control target key end

     0   :  { %s2541_s0 = inlined_call_operand.hbm [shape: f32[2,8,128], index: 0, kind: input, shape index: {}]   ;;  %s2542_s1 = inlined_call_operand.hbm [shape: f32[2,8,128], index: 1, kind: input, shape index: {}]   ;;  %s2543_s2 = inlined_call_operand.vmem [shape: f32[8,8], index: 2, kind: input, shape index: {}]   ;;  %s2544_s3 = inlined_call_operand.vmem [shape: f32[8,8], index: 3, kind: input, shape index: {}]   ;;  %s2545_s4 = inlined_call_operand.vmem [shape: f32[8,1], index: 4, kind: input, shape index: {}]   ;;  %s2546_s5 = inlined_call_operand.vmem [shape: f32[8,8], index: 5, kind: input, shape index: {}]   ;;  %s2547_s6 = inlined_call_operand.hbm [shape: f32[2,8,128], index: 6, kind: output, shape index: {}]  }
   0x1   :  { %2551 = sst [smem:[#allocation11_spill]] %s2541_s0 }
   0x2   :  { %11 = vsyncpa [#allocation3], 0 }
   0x3   :  { %13 = vsyncpa [#allocation3 + $0x1], 0 }
   0x4   :  { %14 = vsyncpa [#allocation6], 0 }
   0x5   :  { %16 = vsyncpa [#allocation6 + $0x1], 0 }
   0x6   :  { %17 = vsyncpa [#allocation4], 0 }
   0x7   :  { %19 = vsyncpa [#allocation4 + $0x1], 0  ;;  %s2230_s21 = smov 0   ;;  %s2232_s22 = smov 0  }
   0x8   :  { %s2234_s23 = smov 0   ;;  %s2236_s24 = smov 0  }
   0x9   :  { %s2238_s25 = smov 0   ;;  %s2240_s26 = smov 0  }
   0xa LB: > { %s1813_s27 = sadd.s32 4294967295, %s2187_s26   ;;  %s1814_s28 = sadd.s32 4294967294, %s2187_s26   ;;  %s2187_s26 = sphi %s2240_s26, %s25_s26   ;;  %s2183_s25 = sphi %s2238_s25, %s2571_s25   ;;  %s2179_s24 = sphi %s2236_s24, %s2570_s24   ;;  %s2175_s23 = sphi %s2234_s23, %s2569_s23   ;;  %s2171_s22 = sphi %s2232_s22, %s2568_s22   ;;  %s2167_s21 = sphi %s2230_s21, %s2567_s21  }
   0xb   : > { %s37_s29 = sadd.s32 1, %s2183_s25  ;;  %s46_s30 = sadd.s32 1, %s2175_s23 }
   0xc   : > { %p39_p0 = scmp.ge.s32.totalorder %s37_s29, 2  ;;  %p53_p1 = scmp.ne.s32.totalorder %s2175_s23, %s2171_s22 }
   0xd   : > { %p54_p2 = scmp.eq.s32.totalorder %s2187_s26, 0  ;;  %p59_p3 = scmp.ne.s32.totalorder %s2171_s22, %s2167_s21 }
   0xe   : > { %s2573_s29 = smov (%p39_p0, %s37_s29), 0  ;;  %p60_p5 = scmp.eq.s32.totalorder %s1813_s27, 0 }
   0xf   : > { %p2271_p4 = por %p54_p2, %p53_p1  ;;  %s41_s8 = ssub.s32 %s2183_s25, %s2573_s29 }
  0x10   : > { %p197_p6 = scmp.eq.s32.totalorder %s1813_s27, 1  ;;  %p44_p7 = scmp.eq.s32.totalorder %s41_s8, 0 }
  0x11   : > { %p2277_p8 = por %p60_p5, %p59_p3  ;;  %p203_p10 = scmp.eq.s32.totalorder %s1814_s28, 1 }
  0x12   : > { %p2281_p9 = por %p197_p6, %p53_p1  ;;  %p1983_p13 = scmp.lt.s32.totalorder %s2187_s26, 2 }
  0x13   : > { %s2553_s9 = scalar_select %p2277_p8, 1, 0 }
  0x14   : > { %s2554_s10 = scalar_select %p2281_p9, 1, 0 }
  0x15   : > { %s2286_s11 = scalar_select %p44_p7, %s2175_s23, %s46_s30  }
  0x16   : > { %p2288_p11 = por %p203_p10, %p59_p3  ;;  %s2295_s13 = sand.u32 1, %s2175_s23  }
  0x17   : > { %s2548_s14 = sshll.u32 %s2295_s13, 3  ;;  %s1818_s15 = sshll.u32 %s2183_s25, 7 }
  0x18   : > { %s2555_s12 = scalar_select %p2288_p11, 1, 0 }
  0x19   : > { %s2556_s0 = sld [smem:[#allocation11_spill]]  ;;  %s239_s19 = scalar_lea.vmem [#allocation2], %s2548_s14 }
  0x1a   : > { %s247_s20 = sshll.u32 %s239_s19, 4  ;;  %p2312_p0 = pnand %p1983_p13, %p2271_p4  ;;  %s2308_s20 = int_to_ptr.vmem [resolvable:$true] %s247_s20 }
  0x1b   : > { %s236_s28 = scalar_lea.sflag [#allocation3], %s2295_s13 }
  0x1c   : > { %p2043_p5 = pneg %p2312_p0 }
  0x1f   : > { %s2304_s18 = scalar_lea.hbm %s2556_s0, %s1818_s15  ;;  %s2046_s7 = scalar_lea.hbm %s2556_s0, 256 }
  0x20   : > { %s2041_s30 = scalar_lea.hbm %s2304_s18, 128  ;;  %p2047_p4 = scmp.lt.u32.totalorder %s2304_s18, %s2556_s0 }
  0x21   : > { %p2042_p3 = scmp.ne.s32.totalorder %s2304_s18, %s2041_s30  ;;  %p2048_p10 = scmp.lt.u32.totalorder %s2046_s7, %s2041_s30 }
  0x22   : > { %p2050_p12 = scmp.lt.u32.totalorder %s2041_s30, %s2304_s18 }
  0x23   : > { %p2044_p6 = pnand %p2043_p5, %p2042_p3  ;;  %p2049_p13 = por %p2048_p10, %p2047_p4 }
  0x25   : > { %p2045_p7 = pneg %p2044_p6  ;;  %p2051_p1 = por %p2050_p12, %p2049_p13 }
  0x27   : > { %p2052_p2 = pnand %p2051_p1, %p2045_p7 }
  0x29   : > { %2055 = shalt.err (!%p2052_p2)
}
  0x2a   : > { %s2056_s14 = scalar_lea.vmem %s2308_s20, 128  ;;  %s2189_s8 = smov [#allocation2]  }
  0x2b   : > { %p2057_p3 = scmp.ne.s32.totalorder %s2308_s20, %s2056_s14  ;;  %s2061_s16 = sshll.u32 %s2189_s8, 4  ;;  %s2062_s16 = int_to_ptr.vmem [resolvable:$false] %s2061_s16 }
  0x2c   : > { %s2063_s17 = scalar_lea.vmem %s2062_s16, 256  ;;  %p2064_p9 = scmp.lt.s32.totalorder %s2308_s20, %s2062_s16 }
  0x2d   : > { %p2059_p6 = pnand %p2057_p3, %p2043_p5  ;;  %p2065_p4 = scmp.lt.s32.totalorder %s2063_s17, %s2056_s14 }
  0x2f   : > { %p2060_p11 = pneg %p2059_p6  ;;  %p2066_p10 = por %p2065_p4, %p2064_p9 }
  0x31   : > { %p2067_p12 = pnand %p2066_p10, %p2060_p11 }
  0x33   : > { %2070 = shalt.err (!%p2067_p12)
}
  0x34   : > { %1975 = dma.hbm_to_vmem [thread:$0]  (!%p2312_p0), %s2304_s18, 128, %s2308_s20, %s236_s28  }
  0x35   : > { %p2558_p1 = scmp.lt.s32.totalorder %s2187_s26, 3  ;;  %p2559_p2 = scmp.ge.s32.totalorder %s2187_s26, 1 }
  0x36   : > { %s2357_s19 = scalar_lea.hbm %s2542_s1, %s1818_s15  ;;  %s2561_s8 = sshll.u32 %s2295_s13, 3 }
  0x37   : > { %p2348_p7 = pnand %p2559_p2, %p2558_p1  ;;  %s258_s16 = scalar_lea.vmem [#allocation5], %s2561_s8 }
  0x38   : > { %s266_s17 = sshll.u32 %s258_s16, 4  ;;  %s255_s18 = scalar_lea.sflag [#allocation6], %s2295_s13  ;;  %s267_s17 = int_to_ptr.vmem [resolvable:$true] %s266_s17 }
  0x39   : > { %s2560_s30 = scalar_select %p2348_p7, 1, 0 }
  0x3a   : > { %s2071_s20 = scalar_lea.hbm %s2357_s19, 128  ;;  %s2076_s15 = scalar_lea.hbm %s2542_s1, 256 }
  0x3b   : > { %p2072_p9 = scmp.ne.s32.totalorder %s2357_s19, %s2071_s20  ;;  %p2077_p3 = scmp.lt.u32.totalorder %s2357_s19, %s2542_s1 }
  0x3c   : > { %p2078_p6 = scmp.lt.u32.totalorder %s2076_s15, %s2071_s20  ;;  %p2080_p10 = scmp.lt.u32.totalorder %s2071_s20, %s2357_s19 }
  0x3d   : > { %p2074_p11 = pnand %p2072_p9, %p2043_p5 }
  0x3e   : > { %p2079_p4 = por %p2078_p6, %p2077_p3 }
  0x3f   : > { %p2075_p13 = pneg %p2074_p11 }
  0x40   : > { %p2081_p12 = por %p2080_p10, %p2079_p4 }
  0x42   : > { %p2082_p1 = pnand %p2081_p12, %p2075_p13 }
  0x44   : > { %2085 = shalt.err (!%p2082_p1)
}
  0x45   : > { %s2086_s13 = scalar_lea.vmem %s267_s17, 128  ;;  %s2190_s8 = smov [#allocation5]  }
  0x46   : > { %p2087_p2 = scmp.ne.s32.totalorder %s267_s17, %s2086_s13  ;;  %s2091_s0 = sshll.u32 %s2190_s8, 4  ;;  %s2092_s0 = int_to_ptr.vmem [resolvable:$false] %s2091_s0 }
  0x47   : > { %s2093_s16 = scalar_lea.vmem %s2092_s0, 256  ;;  %p2094_p8 = scmp.lt.s32.totalorder %s267_s17, %s2092_s0 }
  0x48   : > { %p2089_p9 = pnand %p2087_p2, %p2043_p5  ;;  %p2095_p7 = scmp.lt.s32.totalorder %s2093_s16, %s2086_s13 }
  0x4a   : > { %p2090_p11 = pneg %p2089_p9  ;;  %p2096_p3 = por %p2095_p7, %p2094_p8 }
  0x4c   : > { %p2097_p6 = pnand %p2096_p3, %p2090_p11 }
  0x4e   : > { %2100 = shalt.err (!%p2097_p6)
}
  0x4f   : > { %1978 = dma.hbm_to_vmem [thread:$0]  (!%p2312_p0), %s2357_s19, 128, %s267_s17, %s255_s18  }
  0x50   : > { %p2562_p13 = scmp.ne.s32.totalorder %s2560_s30, 0 }
  0x51   : > { %s2384_s20 = sand.u32 (!%p2562_p13), 1, %s2171_s22   ;;  %p2563_p8 = scmp.ne.s32.totalorder (!%p2562_p13), %s2553_s9, 0 }
  0x52   : > { %275 = sbr.rel (%p2562_p13) target bundleno = 652 (0x28c), region = 44  ;;  %s2387_s28 = sshll.u32 (!%p2562_p13), %s2384_s20, 3 }
  0x53   : > { %s278_s15 = scalar_lea.sflag (!%p2562_p13), [#allocation3], %s2384_s20  ;;  %s281_s14 = scalar_lea.vmem (!%p2562_p13), [#allocation2], %s2387_s28 }
  0x59   : > { %2154 = dma.done.wait (%p2563_p8), %s278_s15, 128  }
  0x5a   : > { %2156 = vsyncadd (%p2563_p8), %s278_s15, 4294967168  ;;  %s287_s27 = scalar_lea.sflag [#allocation6], %s2384_s20  ;;  %s290_s30 = scalar_lea.vmem [#allocation5], %s2387_s28 }
  0x5b   : > { %2158 = dma.done.wait (%p2563_p8), %s287_s27, 128  }
  0x5c   : > { %2160 = vsyncadd (%p2563_p8), %s287_s27, 4294967168  ;;  %v2191_v0 = vmov 0.0   ;;  %vm2192_vm0 = vmmov 0   ;;  %v2193_v1 = vmov 0   ;;  %vm330_vm1 = vcmask 64512   ;;  %v2407_v2 = vld [vmem:[%s290_s30] sm:$0xff] }
  0x5d   : > { %1866 = vmatprep.subr.mxu1 %v2191_v0  ;;  %1868 = vmatprep.mubr.msk.f32.mxu1 %vm2192_vm0, %v2191_v0  ;;  %v325_v3 = vld [vmem:[%s2544_s3] sm:$0xff]  ;;  %v335_v5 = vand.u32 4294901760, %v2407_v2  ;;  %s323_s16 = scalar_lea.vmem [#allocation7], %s2387_s28  ;;  %s1695_s9 = scalar_lea.sflag [#allocation4], %s2384_s20 }
  0x5e   : > { %1896 = vmatprep.subr.mxu0 %v2191_v0  ;;  %1898 = vmatprep.mubr.msk.f32.mxu0 %vm2192_vm0, %v2191_v0  ;;  %v2412_v4 = vld [vmem:[%s281_s14] sm:$0xff]  ;;  %v332_v6 = vsel %vm330_vm1, %v325_v3, 0  ;;  %s1709_s15 = sshll.u32 %s323_s16, 4  ;;  %s1827_s14 = sshll.u32 %s2179_s24, 7  ;;  %s2489_s15 = int_to_ptr.vmem [resolvable:$true] %s1709_s15 }
  0x5f   : > { %2036 = vset.pattern.permute.xlu0 %v2193_v1  ;;  %v2417_v7 = vand.u32 4294901760, %v2412_v4  ;;  %v324_v8 = vld [vmem:[%s2543_s2] sm:$0xff]  ;;  %v400_v10 = vand.u32 4294901760, %v332_v6  ;;  %1867 = vmatpush3.msra.mxu1 %v335_v5  ;;  %v412_v12 = vsub.f32 %v2407_v2, %v335_v5  ;;  %s2494_s19 = scalar_lea.hbm %s2547_s6, %s1827_s14  ;;  %s2101_s17 = scalar_lea.vmem %s2489_s15, 128 }
  0x60   : > { %v327_v9 = vld [vmem:[%s2545_s4] sm:$0xff]  ;;  %v781_v11 = vsel %vm330_vm1, %v324_v8, 0  ;;  %1871 = vmatprep.subr.mxu1 %v2191_v0  ;;  %p2102_p0 = scmp.ne.s32.totalorder %s2489_s15, %s2101_s17  ;;  %p2564_p5 = scmp.ne.s32.totalorder %s2554_s10, 0 }
  0x61   : > { %1231 = vperm.xlu0 %2036, %v327_v9   ;;  %1897 = vmatpush3.msra.mxu0 %v2417_v7  ;;  %v849_v13 = vand.u32 4294901760, %v781_v11  ;;  %v401_v14 = vsub.f32 %v332_v6, %v400_v10  ;;  %v413_v15 = vand.u32 4294901760, %v412_v12  ;;  %v861_v25 = vsub.f32 %v2412_v4, %v2417_v7  ;;  %v326_v6 = vld [vmem:[%s2546_s5] sm:$0xff]  ;;  %s2194_s24 = smov [#allocation7]  }
  0x62   : > { %1906 = vmatprep.subr.mxu0 %v2191_v0  ;;  %p2103_p7 = pnand %p2102_p0, %p2564_p5  ;;  %s2105_s28 = sshll.u32 %s2194_s24, 4  ;;  %s2106_s28 = int_to_ptr.vmem [resolvable:$false] %s2105_s28 }
  0x63   : > { %v850_v16 = vsub.f32 %v781_v11, %v849_v13  ;;  %v402_v17 = vand.u32 4294901760, %v401_v14  ;;  %v414_v18 = vsub.f32 %v412_v12, %v413_v15  ;;  %v862_v26 = vand.u32 4294901760, %v861_v25  ;;  %s2107_s18 = scalar_lea.vmem %s2106_s28, 256  ;;  %p2108_p10 = scmp.lt.s32.totalorder %s2489_s15, %s2106_s28 }
  0x64   : > { %p2104_p4 = pneg %p2103_p7  ;;  %p2109_p12 = scmp.lt.s32.totalorder %s2107_s18, %s2101_s17 }
  0x65   : > { %v851_v19 = vand.u32 4294901760, %v850_v16  ;;  %v403_v20 = vsub.f32 %v401_v14, %v402_v17  ;;  %v415_v21 = vand.u32 4294901760, %v414_v18  ;;  %v863_v27 = vsub.f32 %v861_v25, %v862_v26 }
  0x66   : > { %p2110_p1 = por %p2109_p12, %p2108_p10 }
  0x67   : > { %v852_v22 = vsub.f32 %v850_v16, %v851_v19  ;;  %v404_v23 = vand.u32 4294901760, %v403_v20  ;;  %v864_v28 = vand.u32 4294901760, %v863_v27 }
  0x68   : > { %p2111_p2 = pnand %p2110_p1, %p2104_p4 }
  0x69   : > { %v853_v24 = vand.u32 4294901760, %v852_v22  ;;  %1869 = vmatmul.mubr.f32.vlgmr.msra.gmra.mrb[0].mxu1 %v404_v23 }
  0x6a   : > { %1872 = vmatpush3.msra.mxu1 %v415_v21  ;;  %1873 = vmatprep.mubr.msk.f32.mxu1 %vm2192_vm0, %v2191_v0 }
  0x6b   : > { %1876 = vmatprep.subr.mxu1 %v2191_v0  ;;  %1899 = vmatmul.mubr.f32.vlgmr.msra.gmra.mrb[0].mxu0 %v853_v24 }
  0x6c   : > { %1907 = vmatpush3.msra.mxu0 %v861_v25  ;;  %1908 = vmatprep.mubr.msk.f32.mxu0 %vm2192_vm0, %v2191_v0 }
  0x6d   : > { %1874 = vmatmul.mubr.f32.vlgmr.msra.gmra.mrb[2].mxu1 %v400_v10  ;;  %1916 = vmatprep.subr.mxu0 %v2191_v0 }
  0x6e   : > { %1877 = vmatpush3.msra.mxu1 %v412_v12  ;;  %1878 = vmatprep.mubr.msk.f32.mxu1 %vm2192_vm0, %v2191_v0 }
  0x6f   : > { %1881 = vmatprep.subr.mxu1 %v2191_v0  ;;  %1909 = vmatmul.mubr.f32.vlgmr.msra.gmra.mrb[2].mxu0 %v850_v16 }
  0x70   : > { %1917 = vmatpush3.msra.mxu0 %v862_v26  ;;  %1918 = vmatprep.mubr.msk.f32.mxu0 %vm2192_vm0, %v2191_v0 }
  0x71   : > { %1879 = vmatmul.mubr.f32.vlgmr.msra.gmra.mrb[4].mxu1 %v401_v14  ;;  %1926 = vmatprep.subr.mxu0 %v2191_v0 }
  0x72   : > { %1882 = vmatpush3.msra.mxu1 %v335_v5  ;;  %1883 = vmatprep.mubr.msk.f32.mxu1 %vm2192_vm0, %v2191_v0 }
  0x73   : > { %1886 = vmatprep.subr.mxu1 %v2191_v0  ;;  %1919 = vmatmul.mubr.f32.vlgmr.msra.gmra.mrb[4].mxu0 %v849_v13 }
  0x74   : > { %1928 = vmatprep.mubr.msk.f32.mxu0 %vm2192_vm0, %v2191_v0 }
  0x75   : > { %1884 = vmatmul.mubr.f32.vlgmr.msra.gmra.mrb[6].mxu1 %v402_v17 }
  0x76   : > { %1887 = vmatpush3.msra.mxu1 %v413_v15  ;;  %1888 = vmatprep.mubr.msk.f32.mxu1 %vm2192_vm0, %v2191_v0 }
  0x77   : > { %1891 = vmatprep.subr.mxu1 %v2191_v0 }
  0x79   : > { %1889 = vmatmul.mubr.f32.vlgmr.msra.gmra.mrb[8].mxu1 %v400_v10 }
  0x7a   : > { %1892 = vmatpush3.msra.mxu1 %v335_v5  ;;  %1893 = vmatprep.mubr.msk.f32.mxu1 %vm2192_vm0, %v2191_v0 }
  0x7b   : > { %1901 = vmatprep.subr.mxu1 %v2191_v0 }
  0x7d   : > { %1894 = vmatmul.mubr.f32.vlgmr.msra.gmra.mrb[10].mxu1 %v400_v10 }
  0x7e   : > { %1902 = vmatpush3.msra.mxu1 %v864_v28  ;;  %1903 = vmatprep.mubr.msk.f32.mxu1 %vm2192_vm0, %v2191_v0 }
  0x7f   : > { %1911 = vmatprep.subr.mxu1 %v2191_v0 }
  0x81   : > { %1904 = vmatmul.mubr.f32.vlgmr.msra.gmra.mrb[12].mxu1 %v849_v13 }
  0x82   : > { %1912 = vmatpush3.msra.mxu1 %v2417_v7  ;;  %1913 = vmatprep.mubr.msk.f32.mxu1 %vm2192_vm0, %v2191_v0 }
  0x83   : > { %1921 = vmatprep.subr.mxu1 %v2191_v0 }
  0x85   : > { %1914 = vmatmul.mubr.f32.vlgmr.msra.gmra.mrb[14].mxu1 %v851_v19 }
  0x86   : > { %1922 = vmatpush3.msra.mxu1 %v2417_v7  ;;  %1923 = vmatprep.mubr.msk.f32.mxu1 %vm2192_vm0, %v2191_v0  ;;  %v1245_v7 = vsel %vm330_vm1, %v326_v6, 0 }
  0x87   : > { %v1313_v10 = vand.u32 4294901760, %v1245_v7 }
  0x89   : > { %1924 = vmatmul.mubr.f32.vlgmr.msra.gmra.mrb[16].mxu1 %v849_v13  ;;  %v1314_v11 = vsub.f32 %v1245_v7, %v1313_v10  ;;  %v1241_v13 = vsub.f32 %v2412_v4, %v2407_v2 }
  0x8b   : > { %v1315_v12 = vand.u32 4294901760, %v1314_v11 }
  0x8d   : > { %v1316_v15 = vsub.f32 %v1314_v11, %v1315_v12 }
  0x8f   : > { %v1317_v18 = vand.u32 4294901760, %v1316_v15 }
  0xe0   : > { %v1232_v62 = vpop.permute.xlu0 %1231 }
 0x13c   : > { %v406_v29 = vpop.f32.mrb[0].mxu1 }
 0x13d   : > { %v1870_v30 = vpop.f32.mrb[1].mxu1 }
 0x13e   : > { %v855_v31 = vpop.f32.mrb[0].mxu0 }
 0x13f   : > { %v1900_v32 = vpop.f32.mrb[1].mxu0 }
 0x140   : > { %v482_v33 = vpop.f32.mrb[2].mxu1 }
 0x141   : > { %v483_v34 = vadd.f32 %v482_v33, %v406_v29  ;;  %v1875_v35 = vpop.f32.mrb[3].mxu1 }
 0x142   : > { %v1005_v36 = vpop.f32.mrb[2].mxu0 }
 0x143   : > { %v1910_v37 = vpop.f32.mrb[3].mxu0 }
 0x144   : > { %v556_v38 = vpop.f32.mrb[4].mxu1 }
 0x145   : > { %v557_v39 = vadd.f32 %v556_v38, %v483_v34  ;;  %v1880_v40 = vpop.f32.mrb[5].mxu1 }
 0x146   : > { %v1153_v41 = vpop.f32.mrb[4].mxu0 }
 0x147   : > { %v1920_v42 = vpop.f32.mrb[5].mxu0 }
 0x148   : > { %v630_v43 = vpop.f32.mrb[6].mxu1 }
 0x149   : > { %v631_v44 = vadd.f32 %v630_v43, %v557_v39  ;;  %v1885_v45 = vpop.f32.mrb[7].mxu1 }
 0x14c   : > { %v704_v46 = vpop.f32.mrb[8].mxu1 }
 0x14d   : > { %v705_v47 = vadd.f32 %v704_v46, %v631_v44  ;;  %v1890_v48 = vpop.f32.mrb[9].mxu1 }
 0x150   : > { %v776_v49 = vpop.f32.mrb[10].mxu1 }
 0x151   : > { %v777_v50 = vadd.f32 %v776_v49, %v705_v47  ;;  %v1895_v51 = vpop.f32.mrb[11].mxu1 }
 0x153   : > { %v856_v52 = vadd.f32 %v855_v31, %v777_v50 }
 0x154   : > { %v931_v53 = vpop.f32.mrb[12].mxu1 }
 0x155   : > { %v932_v54 = vadd.f32 %v931_v53, %v856_v52  ;;  %v1905_v55 = vpop.f32.mrb[13].mxu1 }
 0x157   : > { %v1006_v56 = vadd.f32 %v1005_v36, %v932_v54 }
 0x158   : > { %v1079_v57 = vpop.f32.mrb[14].mxu1 }
 0x159   : > { %v1080_v58 = vadd.f32 %v1079_v57, %v1006_v56  ;;  %v1915_v59 = vpop.f32.mrb[15].mxu1 }
 0x15b   : > { %v1154_v60 = vadd.f32 %v1153_v41, %v1080_v58 }
 0x15c   : > { %v1225_v61 = vpop.f32.mrb[16].mxu1 }
 0x15d   : > { %v1226_v63 = vadd.f32 %v1225_v61, %v1154_v60  ;;  %v1925_v1 = vpop.f32.mrb[17].mxu1 }
 0x15f   : > { %v1234_v3 = vadd.f32 %v1232_v62, %v1226_v63 }
 0x161   : > { %v1825_v5 = vmul.f32 -1.442695, %v1234_v3 }
 0x163   : > { %2037 = vpow2.f32 %v1825_v5 }
 0x16d   : > { %v2038_v8 = vpop.eup %2037 }
 0x16e   : > { %v1238_v9 = vadd.f32 1.0, %v2038_v8 }
 0x170   : > { %2039 = vrcp.f32 %v1238_v9 }
 0x17a   : > { %v2040_v14 = vpop.eup %2039 }
 0x17b   : > { %v1242_v16 = vmul.f32 %v2040_v14, %v1241_v13 }
 0x17d   : > { %v1243_v17 = vadd.f32 %v1242_v16, %v2407_v2 }
 0x17f   : > { %v1248_v19 = vand.u32 4294901760, %v1243_v17 }
 0x181   : > { %1927 = vmatpush3.msra.mxu0 %v1248_v19  ;;  %v1325_v20 = vsub.f32 %v1243_v17, %v1248_v19 }
 0x182   : > { %1929 = vmatmul.mubr.f32.vlgmr.msra.gmra.mrb[6].mxu0 %v1317_v18  ;;  %1931 = vmatprep.subr.mxu0 %v2191_v0 }
 0x183   : > { %v1326_v21 = vand.u32 4294901760, %v1325_v20  ;;  %1933 = vmatprep.mubr.msk.f32.mxu0 %vm2192_vm0, %v2191_v0 }
 0x185   : > { %v1327_v22 = vsub.f32 %v1325_v20, %v1326_v21 }
 0x187   : > { %v1328_v23 = vand.u32 4294901760, %v1327_v22 }
 0x189   : > { %1932 = vmatpush3.msra.mxu0 %v1328_v23 }
 0x18a   : > { %1934 = vmatmul.mubr.f32.vlgmr.msra.gmra.mrb[6].mxu0 %v1313_v10  ;;  %1936 = vmatprep.subr.mxu0 %v2191_v0 }
 0x18b   : > { %1937 = vmatpush3.msra.mxu0 %v1325_v20  ;;  %1938 = vmatprep.mubr.msk.f32.mxu0 %vm2192_vm0, %v2191_v0 }
 0x18c   : > { %1941 = vmatprep.subr.mxu0 %v2191_v0 }
 0x192   : > { %1939 = vmatmul.mubr.f32.vlgmr.msra.gmra.mrb[6].mxu0 %v1314_v11 }
 0x193   : > { %1942 = vmatpush3.msra.mxu0 %v1248_v19  ;;  %1943 = vmatprep.mubr.msk.f32.mxu0 %vm2192_vm0, %v2191_v0 }
 0x194   : > { %1946 = vmatprep.subr.mxu0 %v2191_v0 }
 0x19a   : > { %1944 = vmatmul.mubr.f32.vlgmr.msra.gmra.mrb[6].mxu0 %v1315_v12 }
 0x19b   : > { %1947 = vmatpush3.msra.mxu0 %v1326_v21  ;;  %1948 = vmatprep.mubr.msk.f32.mxu0 %vm2192_vm0, %v2191_v0 }
 0x19c   : > { %1951 = vmatprep.subr.mxu0 %v2191_v0 }
 0x1a2   : > { %1949 = vmatmul.mubr.f32.vlgmr.msra.gmra.mrb[6].mxu0 %v1313_v10 }
 0x1a3   : > { %1952 = vmatpush3.msra.mxu0 %v1248_v19  ;;  %1953 = vmatprep.mubr.msk.f32.mxu0 %vm2192_vm0, %v2191_v0 }
 0x1aa   : > { %1954 = vmatmul.mubr.f32.vlgmr.msra.gmra.mrb[6].mxu0 %v1313_v10 }
 0x27d   : > { %v1689_v2 = vpop.f32.mrb[6].mxu0 }
 0x27e   : > { %1693 = vst [vmem:[%s323_s16] sm:$0xff] %v1689_v2  ;;  %v1955_v4 = vpop.f32.mrb[7].mxu0 }
 0x27f   : > { %2114 = shalt.err (!%p2111_p2)
}
 0x280   : > { %s2115_s20 = scalar_lea.hbm %s2494_s19, 128  ;;  %s2119_s8 = scalar_lea.hbm %s2547_s6, 256 }
 0x281   : > { %p2116_p9 = scmp.ne.s32.totalorder %s2494_s19, %s2115_s20  ;;  %p2120_p6 = scmp.lt.u32.totalorder %s2494_s19, %s2547_s6 }
 0x282   : > { %p2121_p13 = scmp.lt.u32.totalorder %s2119_s8, %s2115_s20  ;;  %p2123_p0 = scmp.lt.u32.totalorder %s2115_s20, %s2494_s19 }
 0x283   : > { %p2117_p11 = pnand %p2116_p9, %p2564_p5 }
 0x284   : > { %p2122_p8 = por %p2121_p13, %p2120_p6 }
 0x285   : > { %p2118_p3 = pneg %p2117_p11 }
 0x286   : > { %p2124_p7 = por %p2123_p0, %p2122_p8 }
 0x288   : > { %p2125_p4 = pnand %p2124_p7, %p2118_p3 }
 0x28a   : > { %2128 = shalt.err (!%p2125_p4)
}
 0x28b   : > { %1970 = dma.vmem_to_hbm [thread:$0]  (%p2564_p5), %s2489_s15, 128, %s2494_s19, %s1695_s9  }
 0x28c PF: > { %s1721_s14 = sand.u32 1, %s2167_s21   ;;  %p2565_p10 = scmp.ne.s32.totalorder %s2555_s12, 0 }
 0x28d   : > { %p2566_p12 = scmp.ge.s32.totalorder %s2187_s26, 2  ;;  %s1722_s27 = scalar_lea.sflag [#allocation4], %s1721_s14 }
 0x28f   : > { %p1980_p1 = pnand %p2566_p12, %p2565_p10 }
 0x291   : > { %2162 = dma.done.wait (!%p1980_p1), %s1722_s27, 128  }
 0x292   : > { %2164 = vsyncadd (!%p1980_p1), %s1722_s27, 4294967168  ;;  %s25_s26 = sadd.s32 1, %s2187_s26   ;;  %s2567_s21 = smov %s2171_s22 }
 0x293   : > { %p22_p2 = scmp.ge.s32.totalorder %s25_s26, 4   ;;  %s2568_s22 = smov %s2175_s23 }
 0x294   : > { %s2569_s23 = smov %s2286_s11  ;;  %s2570_s24 = smov %s2183_s25 }
 0x295   : > { %s2571_s25 = smov %s2573_s29  ;;  %24 = sbr.rel (!%p22_p2) target bundleno = 10 (0xa), region = 102 }
 0x29c   :  { %1727 = vsyncpa [#allocation3], 1 }
 0x29d   :  { %1729 = vsyncpa [#allocation3 + $0x1], 1 }
 0x29e   :  { %1730 = vsyncpa [#allocation6], 1 }
 0x29f   :  { %1732 = vsyncpa [#allocation6 + $0x1], 1 }
 0x2a0   :  { %1733 = vsyncpa [#allocation4], 1 }
 0x2a1   :  { %1735 = vsyncpa [#allocation4 + $0x1], 1 }

</bundles_post_ra>
